<compile_context>
chip_gen: v7x
topology: tpu7x:2x2x1
jax: 0.10.0
libtpu: 0.0.40
codegen_flags: <defaults>
</compile_context>

<pallas_src>
import functools
import math

import jax
import jax.numpy as jnp
from jax.experimental import pallas as pl
from jax.experimental.pallas import tpu as pltpu

_LANE = 128
_TILE_BYTES = 6 * 1024 * 1024      # padded bytes per input block (x2 double-buffered)
_VMEM_LIMIT = 32 * 1024 * 1024     # safe on v5e / v6e / v7x
_MIN_PALLAS_BYTES = 1 << 20        # below this, XLA's fused reduction is faster
_WIDE_L = 4096                     # above this, tile the lane axis


def _round_up(x, m):
    return ((x + m - 1) // m) * m


def _sum_kernel(x_ref, o_ref, *, rb, n_r_steps, rows_total, need_mask):
    """x_ref: (RB, TL) input block.  o_ref: (1, 1, TL) resident f32 accumulator."""
    r = pl.program_id(2)                         # reduction axis: last, "arbitrary"

    @pl.when(r == 0)
    def _():
        o_ref[...] = jnp.zeros_like(o_ref)

    x = x_ref[...]
    if need_mask:
        # Boundary block along R: rows past the true extent hold unspecified
        # data (Pallas does NOT zero them) -> mask explicitly.  The compare /
        # select is VPU filler hidden under the HBM-bound loads.
        s = pl.program_id(0)
        row0 = (s * n_r_steps + r) * rb
        rows = row0 + jax.lax.broadcasted_iota(jnp.int32, x.shape, 0)
        x = jnp.where(rows < rows_total, x, 0)

    # dtype=f32 fuses the widening into the reduction (no f32 copy of the block).
    o_ref[...] += jnp.sum(x, axis=0, dtype=jnp.float32).reshape(o_ref.shape)


def pallas_sum(image_source, is_1D, *, tile_bytes=_TILE_BYTES,
               min_bytes=_MIN_PALLAS_BYTES):
    """Reproduces torch.sum(image_source, dim=0 if is_1D else (0, 1))."""
    x = jnp.asarray(image_source)
    n_red = 1 if is_1D else 2
    if x.ndim < n_red:
        raise ValueError("input rank too small for the requested reduction")

    axes = tuple(range(n_red))
    rest = x.shape[n_red:]

    # Non-float dtypes: defer to XLA for exact integer accumulation
    # (Net only ever stores a float32 parameter).
    if not jnp.issubdtype(x.dtype, jnp.floating):
        return jnp.sum(x, axis=axes)

    out_dtype = x.dtype
    R = int(math.prod(x.shape[:n_red]))
    L = int(math.prod(rest))            # == 1 when rest is empty (scalar output)

    if R == 0 or L == 0:                # torch.sum semantics on empty axes
        return jnp.zeros(rest, dtype=out_dtype)

    itemsize = jnp.dtype(x.dtype).itemsize
    if R * L * itemsize < min_bytes:    # tiny input: launch overhead dominates
        return jnp.sum(x, axis=axes).astype(out_dtype)

    x_flat = x.reshape(R, L)            # free (contiguous, row-major)

    # --- Narrow trailing slab: fold reduction rows into the lane axis with a
    # free reshape so blocks are lane-dense.  out = folded.reshape(k, L).sum(0).
    fold_k = 1
    if L < 512:
        k = _LANE // math.gcd(L, _LANE)
        if k > 1 and R >= k and R % k == 0:
            fold_k = k
            x_flat = x_flat.reshape(R // k, k * L)   # free reshape; k*L % 128 == 0
            R, L = R // k, k * L

    # --- Lane tiling ---
    if L <= _WIDE_L:
        TL, n_l_tiles = L, 1            # full-dim lane block
    else:
        TL = 1024                       # multiple of 128; boundary block masked by slicing
        n_l_tiles = pl.cdiv(L, TL)
    lane_pad = _round_up(TL, _LANE)     # what a block row really occupies in VMEM

    # --- Reduction blocking (VMEM accounting uses the padded block size) ---
    row_bytes = lane_pad * itemsize
    rb_cap = max(8, (tile_bytes // row_bytes) // 8 * 8)
    if R <= rb_cap:
        RB, n_r_blocks = R, 1           # single full-dim block along R
    else:
        RB = rb_cap                     # multiple of 8
        n_r_blocks = pl.cdiv(R, RB)

    # v7x: when the lane grid collapses to one tile, split the reduction blocks
    # across a leading parallel axis so both TensorCores get work.
    n_split = 2 if (n_l_tiles == 1 and n_r_blocks >= 8) else 1
    n_r_steps = pl.cdiv(n_r_blocks, n_split)
    need_mask = (n_split * n_r_steps * RB) != R

    L_out = n_l_tiles * TL              # pad only the (tiny) output, never the input

    kernel = functools.partial(_sum_kernel, rb=RB, n_r_steps=n_r_steps,
                               rows_total=R, need_mask=need_mask)

    out = pl.pallas_call(
        kernel,
        out_shape=jax.ShapeDtypeStruct((n_split, 1, L_out), jnp.float32),
        grid=(n_split, n_l_tiles, n_r_steps),
        in_specs=[pl.BlockSpec(
            (RB, TL),
            # Clamp so a fully-out-of-range block (odd block count split over 2
            # cores) never escapes the array; its rows are masked to zero anyway.
            lambda s, m, r: (jnp.minimum(s * n_r_steps + r, n_r_blocks - 1), m))],
        out_specs=pl.BlockSpec((1, 1, TL), lambda s, m, r: (s, 0, m)),
        compiler_params=pltpu.CompilerParams(
            dimension_semantics=("parallel", "parallel", "arbitrary"),
            vmem_limit_bytes=_VMEM_LIMIT),
    )(x_flat)

    res = out.sum(axis=0)[0, :L]        # combine split partials (tiny, output-sized)
    if fold_k > 1:
        res = res.reshape(fold_k, L // fold_k).sum(axis=0)
    return res.reshape(rest).astype(out_dtype)


class Net:
    """JAX/Pallas analogue of the PyTorch Net module (forward only)."""

    def __init__(self, data_source, is_1D):
        # The torch module stores the data as a float32 Parameter.
        # TODO(synk): nn.Parameter / autograd (requires_grad) training state has
        # no Pallas equivalent; only the forward pass is implemented.
        self.image_source = jnp.asarray(data_source, dtype=jnp.float32)
        self.is_1D = is_1D
        self.dim = 0 if is_1D else (0, 1)

    def forward(self):
        self.image = pallas_sum(self.image_source, self.is_1D)
        return self.image

    def get_lf(self):
        return self.image_source

    def criterion(self, prediction, label):
        # MSELoss (mean reduction) — plain JAX glue, not the hot path.
        return jnp.mean((prediction - label) ** 2)


def _check(name, got, want, atol=1e-3, rtol=1e-5):
    got = jax.block_until_ready(got)
    want = jax.block_until_ready(want)
    if got.shape != want.shape:
        raise SystemExit(f"MISMATCH ({name}): shape {got.shape} vs {want.shape}")
    if not bool(jnp.allclose(got, want, atol=atol, rtol=rtol)):
        raise SystemExit(f"MISMATCH ({name})")


if __name__ == "__main__":
    key = jax.random.PRNGKey(0)
    k1, k2, k3, k4, k5, k6, k7 = jax.random.split(key, 7)

    # 1) Module-level check at the spec's small shape: sum over dims (0, 1).
    data = jax.random.normal(k1, (2, 4, 16, 16), dtype=jnp.float32)
    net = Net(data, is_1D=False)
    _check("net_forward", net.forward(), jnp.sum(data, axis=(0, 1)))

    # 2) Same shape through the Pallas kernel (tiny-input bypass disabled).
    _check("pallas_small", pallas_sum(data, False, min_bytes=0),
           jnp.sum(data, axis=(0, 1)))

    # 3) is_1D with a narrow trailing slab -> lane-fold path ((8, 32) -> (2, 128)).
    d = jax.random.normal(k2, (8, 32), dtype=jnp.float32)
    _check("fold_narrow", pallas_sum(d, True, min_bytes=0), jnp.sum(d, axis=0))

    # 4) Scalar output via the fold path ((8, 16): R=128, L=1 -> (1, 128)).
    d = jax.random.normal(k3, (8, 16), dtype=jnp.float32)
    _check("fold_scalar", pallas_sum(d, False, min_bytes=0), jnp.sum(d))

    # 5) Scalar output, tiny input -> jnp.sum bypass path.
    d = jax.random.normal(k4, (4, 6), dtype=jnp.float32)
    _check("tiny_bypass", pallas_sum(d, False), jnp.sum(d))

    # 6) Non-dividing trailing slab with full-dim blocks ((7, 200)).
    d = jax.random.normal(k5, (7, 200), dtype=jnp.float32)
    _check("ragged_L", pallas_sum(d, True, min_bytes=0), jnp.sum(d, axis=0))

    # 7) Multi-step reduction + lane tiling + ragged R and L boundaries.
    d = jax.random.normal(k6, (260, 4500), dtype=jnp.float32)
    _check("multistep_wide",
           pallas_sum(d, True, tile_bytes=64 * 1024, min_bytes=0),
           jnp.sum(d, axis=0), atol=2e-2)

    # 8) Reduction blocks split across the leading parallel axis (2-TC path).
    d = jax.random.normal(k7, (2000, 256), dtype=jnp.float32)
    _check("r_split",
           pallas_sum(d, True, tile_bytes=128 * 1024, min_bytes=0),
           jnp.sum(d, axis=0), atol=2e-2)

    print("KERNEL_OK")
</pallas_src>

<mosaic_0001>
module attributes {stable_mosaic.version = 11 : i64} {
  func.func @_sum_kernel(%arg0: i32, %arg1: i32, %arg2: i32, %arg3: memref<8x256xf32, #tpu.memory_space<vmem>>, %arg4: memref<1x1x256xf32, #tpu.memory_space<vmem>>) attributes {dimension_semantics = [#tpu.dimension_semantics<parallel>, #tpu.dimension_semantics<parallel>, #tpu.dimension_semantics<arbitrary>], iteration_bounds = array<i64: 1, 1, 1>, scalar_prefetch = 0 : i64, scratch_operands = 0 : i64, tpu.core_type = #tpu.core_type<tc>, window_params = [{transform_indices = @transform_0, window_bounds = array<i64: 8, 256>}, {transform_indices = @transform_1, window_bounds = array<i64: 1, 1, 256>}]} {
    %c0_i32 = arith.constant 0 : i32
    %0 = arith.cmpi eq, %arg2, %c0_i32 : i32
    %1 = arith.extui %0 : i1 to i32
    %c0_i32_0 = arith.constant 0 : i32
    %2 = arith.cmpi ne, %1, %c0_i32_0 : i32
    scf.if %2 {
      %cst_8 = arith.constant 0.000000e+00 : f32
      %9 = vector.broadcast %cst_8 : f32 to vector<1x1x256xf32>
      %c0_9 = arith.constant 0 : index
      %c0_10 = arith.constant 0 : index
      %c0_11 = arith.constant 0 : index
      %10 = vector.load %arg4[%c0_9, %c0_10, %c0_11] : memref<1x1x256xf32, #tpu.memory_space<vmem>>, vector<1x1x256xf32>
      tpu.vector_store %arg4[%c0_9, %c0_10, %c0_11], %9 {strides = array<i32>} : memref<1x1x256xf32, #tpu.memory_space<vmem>>, vector<1x1x256xf32>,
    } else {
    }
    %c0 = arith.constant 0 : index
    %c0_1 = arith.constant 0 : index
    %3 = vector.load %arg3[%c0, %c0_1] : memref<8x256xf32, #tpu.memory_space<vmem>>, vector<8x256xf32>
    %c0_2 = arith.constant 0 : index
    %c0_3 = arith.constant 0 : index
    %c0_4 = arith.constant 0 : index
    %4 = vector.load %arg4[%c0_2, %c0_3, %c0_4] : memref<1x1x256xf32, #tpu.memory_space<vmem>>, vector<1x1x256xf32>
    %cst = arith.constant dense<0.000000e+00> : vector<256xf32>
    %5 = vector.multi_reduction <add>, %3, %cst [0] : vector<8x256xf32> to vector<256xf32>
    %6 = vector.shape_cast %5 : vector<256xf32> to vector<1x1x256xf32>
    %7 = arith.addf %4, %6 : vector<1x1x256xf32>
    %c0_5 = arith.constant 0 : index
    %c0_6 = arith.constant 0 : index
    %c0_7 = arith.constant 0 : index
    %8 = vector.load %arg4[%c0_5, %c0_6, %c0_7] : memref<1x1x256xf32, #tpu.memory_space<vmem>>, vector<1x1x256xf32>
    tpu.vector_store %arg4[%c0_5, %c0_6, %c0_7], %7 {strides = array<i32>} : memref<1x1x256xf32, #tpu.memory_space<vmem>>, vector<1x1x256xf32>,
    return
  }
  func.func @transform_0(%arg0: i32, %arg1: i32, %arg2: i32) -> (i32, i32) {
    %c1_i32 = arith.constant 1 : i32
    %0 = arith.muli %arg0, %c1_i32 : i32
    %1 = arith.addi %0, %arg2 : i32
    %c0_i32 = arith.constant 0 : i32
    %2 = arith.minsi %1, %c0_i32 : i32
    %c0_i32_0 = arith.constant 0 : i32
    return %2, %arg1 : i32, i32
  }
  func.func @transform_1(%arg0: i32, %arg1: i32, %arg2: i32) -> (i32, i32, i32) {
    %c0_i32 = arith.constant 0 : i32
    %c0_i32_0 = arith.constant 0 : i32
    return %arg0, %c0_i32, %arg1 : i32, i32, i32
  }
}

</mosaic_0001>

<bundles_post_ra>
// kernel: tpu_custom_call.1
= control target key start
LH: loop header
LB: loop body
LE: loop exit
PB: predicated region body
PF: predicated region fallthrough
CT: control target
= control target key end

     0   :  { %6 = vsyncpa [#allocation3], 0  ;;  %s193_s0 = inlined_call_operand.hbm [shape: f32[8,256], index: 0, kind: input, shape index: {}]   ;;  %s194_s1 = inlined_call_operand.hbm [shape: f32[1,1,256], index: 1, kind: output, shape index: {}]  }
   0x1   :  { %7 = vsyncpa [#allocation4], 0  ;;  %s147_s6 = smov [#allocation2]   ;;  %s99_s10 = scalar_lea.hbm %s193_s0, 256 }
   0x2   :  { %s20_s7 = sshll.u32 %s147_s6, 4  ;;  %p100_p0 = scmp.ne.s32.totalorder %s193_s0, %s99_s10  ;;  %s21_s7 = int_to_ptr.vmem [resolvable:$true] %s20_s7 }
   0x3   :  { %p103_p1 = scmp.lt.u32.totalorder %s99_s10, %s193_s0 }
   0x5   :  { %p105_p2 = pnand %p103_p1, %p100_p0 }
   0x7   :  { %108 = shalt.err (!%p105_p2)
}
   0x8   :  { %s109_s15 = scalar_lea.vmem %s21_s7, 256  ;;  %p114_p4 = scmp.lt.s32.totalorder %s21_s7, %s21_s7 }
   0x9   :  { %p110_p3 = scmp.ne.s32.totalorder %s21_s7, %s109_s15  ;;  %p115_p5 = scmp.lt.s32.totalorder %s109_s15, %s109_s15 }
   0xb   :  { %p116_p6 = por %p115_p5, %p114_p4 }
   0xd   :  { %p117_p7 = pnand %p116_p6, %p110_p3 }
   0xf   :  { %120 = shalt.err (!%p117_p7)
}
  0x10   :  { %23 = dma.hbm_to_vmem [thread:$0]  %s193_s0, 256, %s21_s7, [#allocation3]  }
  0x11   :  { %143 = dma.done.wait [#allocation3], 256  }
  0x12   :  { %144 = vsyncadd [#allocation3], 4294967040  ;;  %v34_v0 = vlaneseq  ;;  %v148_v2 = vmov 0.0   ;;  %v39_v3 = vld [vmem:[#allocation2] sm:$0xff]  ;;  %v40_v4 = vld [vmem:[#allocation2 + $0x8] sm:$0xff]  ;;  %s150_s0 = smov [#allocation5]  }
  0x13   :  { %v42_v5 = vrot.slane %v39_v3, 4  ;;  %v48_v6 = vrot.slane %v40_v4, 4  ;;  %v149_v9 = vmov 1966171168   ;;  %s84_s18 = sshll.u32 %s150_s0, 4  ;;  %s85_s18 = int_to_ptr.vmem [resolvable:$true] %s84_s18 }
  0x14   :  { %vm173_vm0 = vcmp.lt.s32.totalorder %v34_v0, 256  ;;  %v58_v10 = vunpack.c.l.s4 %v149_v9  ;;  %v61_v16 = vshrl.u32 %v34_v0, 7  ;;  %s121_s19 = scalar_lea.vmem %s85_s18, 32  ;;  %p126_p9 = scmp.lt.s32.totalorder %s85_s18, %s85_s18 }
  0x15   :  { %38 = vst.msk [vmem:[#allocation5] sm:$0x3] %vm173_vm0, %v148_v2  ;;  %v43_v7 = vadd.f32 %v42_v5, %v39_v3  ;;  %v49_v8 = vadd.f32 %v48_v6, %v40_v4  ;;  %p122_p8 = scmp.ne.s32.totalorder %s85_s18, %s121_s19  ;;  %p127_p10 = scmp.lt.s32.totalorder %s121_s19, %s121_s19 }
  0x16   :  { %v59_v15 = vunpack.c.0.s8 %v58_v10 }
  0x17   :  { %v44_v11 = vrot.slane %v43_v7, 2  ;;  %v50_v12 = vrot.slane %v49_v8, 2  ;;  %p128_p11 = por %p127_p10, %p126_p9 }
  0x18   :  { %v62_v21 = vsub.s32 %v59_v15, %v61_v16 }
  0x19   :  { %v45_v13 = vadd.f32 %v44_v11, %v43_v7  ;;  %v51_v14 = vadd.f32 %v50_v12, %v49_v8  ;;  %p129_p12 = pnand %p128_p11, %p122_p8 }
  0x1b   :  { %v46_v17 = vrot.slane %v45_v13, 1  ;;  %v52_v18 = vrot.slane %v51_v14, 1 }
  0x1c   :  { %v41_v24 = vld [vmem:[#allocation5] sm:$0x3] }
  0x1d   :  { %v47_v19 = vadd.f32 %v46_v17, %v45_v13  ;;  %v53_v20 = vadd.f32 %v52_v18, %v51_v14 }
  0x1f   :  { %v56_v22 = vcombine.low %v47_v19, %v53_v20 }
  0x21   :  { %v63_v23 = vrot.slane %v56_v22, %v62_v21 }
  0x23   :  { %v70_v25 = vrot.slane %v63_v23, %v62_v21 }
  0x25   :  { %v72_v26 = vadd.f32 %v70_v25, %v41_v24 }
  0x27   :  { %77 = vst.msk [vmem:[#allocation5] sm:$0x3] %vm173_vm0, %v72_v26 }
  0x28   :  { %132 = shalt.err (!%p129_p12)
}
  0x29   :  { %s133_s22 = scalar_lea.hbm %s194_s1, 32 }
  0x2a   :  { %p134_p13 = scmp.ne.s32.totalorder %s194_s1, %s133_s22  ;;  %p137_p0 = scmp.lt.u32.totalorder %s133_s22, %s194_s1 }
  0x2c   :  { %p139_p1 = pnand %p137_p0, %p134_p13 }
  0x2e   :  { %142 = shalt.err (!%p139_p1)
}
  0x2f   :  { %87 = dma.vmem_to_hbm [thread:$0]  %s85_s18, 32, %s194_s1, [#allocation4]  }
  0x30   :  { %145 = dma.done.wait [#allocation4], 32  }
  0x31   :  { %146 = vsyncadd [#allocation4], 4294967264 }
  0x32   :  { %91 = vsyncpa [#allocation3], 1 }
  0x33   :  { %92 = vsyncpa [#allocation4], 1 }

</bundles_post_ra>
